<compile_context>
chip_gen: v7x
topology: tpu7x:2x2x1
jax: 0.10.0
libtpu: 0.0.40
codegen_flags: <defaults>
</compile_context>

<pallas_src>
import functools

import jax
import jax.numpy as jnp
from jax.experimental import pallas as pl
from jax.experimental.pallas import tpu as pltpu


def _round_up(x: int, m: int) -> int:
    return ((x + m - 1) // m) * m


def mlp_kernel(x_ref, w1_ref, b1_ref, w2_ref, b2_ref, o_ref):
    # fc1: (TM, In) @ (In, H) -> f32 accumulate on the MXU
    h = jnp.dot(x_ref[...], w1_ref[...], preferred_element_type=jnp.float32)
    # bias + ReLU in f32 on the VPU
    h = jnp.maximum(h + b1_ref[...], 0.0)
    # dropout(p=0.2): identity in eval mode
    # fc2: (TM, H) @ (H, Out) -> f32 accumulate; feed the MXU bf16 operands
    y = jnp.dot(h.astype(w2_ref.dtype), w2_ref[...],
                preferred_element_type=jnp.float32)
    o_ref[...] = (y + b2_ref[...]).astype(o_ref.dtype)


@functools.partial(jax.jit, static_argnames=("tm",))
def mlp_forward(x, w1, b1, w2, b2, *, tm=256):
    """x: (B, In); w1: (In, H); b1: (H,); w2: (H, Out); b2: (Out,).

    Weights are stored (in, out) so the kernel computes x @ W + b, matching
    torch.nn.Linear's y = x @ W.T + b.
    """
    B, In = x.shape
    H = w1.shape[1]
    Out = w2.shape[1]

    # Lane-dense padding: all feature dims -> multiples of 128.
    In_p = _round_up(In, 128)
    H_p = _round_up(H, 128)
    Out_p = _round_up(Out, 128)

    # Batch tile: up to `tm` rows (multiple of 8 sublanes), amortizes the
    # per-grid-step overhead while keeping the MXU M-dim well fed.
    TM = min(tm, _round_up(B, 8))
    B_pad = _round_up(B, TM)

    # Zero-pad (zeros are neutral: padded H columns are relu(0)=0 and padded
    # w2 rows are 0, so they contribute nothing to the real outputs).
    x_p = jnp.zeros((B_pad, In_p), jnp.bfloat16).at[:B, :In].set(
        x.astype(jnp.bfloat16))
    w1_p = jnp.zeros((In_p, H_p), jnp.bfloat16).at[:In, :H].set(
        w1.astype(jnp.bfloat16))
    w2_p = jnp.zeros((H_p, Out_p), jnp.bfloat16).at[:H, :Out].set(
        w2.astype(jnp.bfloat16))
    b1_p = jnp.zeros((1, H_p), jnp.float32).at[0, :H].set(b1.astype(jnp.float32))
    b2_p = jnp.zeros((1, Out_p), jnp.float32).at[0, :Out].set(b2.astype(jnp.float32))

    # VMEM budget estimate (bytes): double-buffered x/out tiles, resident
    # bf16 weights, f32 biases, (TM, H) f32 intermediate — with 2x headroom,
    # kept comfortably under v7x's 64 MiB when possible.
    est = (2 * TM * In_p * 2            # x tiles (bf16, double-buffered)
           + In_p * H_p * 2             # w1 (bf16, resident)
           + H_p * Out_p * 2            # w2 (bf16, resident)
           + (H_p + Out_p) * 4          # biases (f32, resident)
           + 2 * TM * Out_p * 4         # out tiles (f32, double-buffered)
           + TM * H_p * 4)              # fc1 intermediate (f32)
    vmem_limit = int(min(max(2 * est, 8 << 20), 120 << 20))

    grid = (B_pad // TM,)
    out_p = pl.pallas_call(
        mlp_kernel,
        out_shape=jax.ShapeDtypeStruct((B_pad, Out_p), jnp.float32),
        grid_spec=pl.GridSpec(
            grid=grid,
            in_specs=[
                pl.BlockSpec((TM, In_p), lambda i: (i, 0)),    # streamed x
                pl.BlockSpec((In_p, H_p), lambda i: (0, 0)),   # resident w1
                pl.BlockSpec((1, H_p), lambda i: (0, 0)),      # resident b1
                pl.BlockSpec((H_p, Out_p), lambda i: (0, 0)),  # resident w2
                pl.BlockSpec((1, Out_p), lambda i: (0, 0)),    # resident b2
            ],
            out_specs=pl.BlockSpec((TM, Out_p), lambda i: (i, 0)),
        ),
        compiler_params=pltpu.CompilerParams(
            dimension_semantics=("parallel",),
            vmem_limit_bytes=vmem_limit,
        ),
    )(x_p, w1_p, b1_p, w2_p, b2_p)

    return out_p[:B, :Out]


def init_params(key, input_size, hidden_size, output_size):
    """Deterministic init mimicking nn.Linear's uniform(-1/sqrt(fan_in), ...)."""
    k1, k2, k3, k4 = jax.random.split(key, 4)
    lim1 = 1.0 / jnp.sqrt(input_size)
    lim2 = 1.0 / jnp.sqrt(hidden_size)
    # stored as (in, out) so the kernel computes x @ W (== x @ W_torch.T)
    w1 = jax.random.uniform(k1, (input_size, hidden_size), jnp.float32, -lim1, lim1)
    b1 = jax.random.uniform(k2, (hidden_size,), jnp.float32, -lim1, lim1)
    w2 = jax.random.uniform(k3, (hidden_size, output_size), jnp.float32, -lim2, lim2)
    b2 = jax.random.uniform(k4, (output_size,), jnp.float32, -lim2, lim2)
    return w1, b1, w2, b2


if __name__ == "__main__":
    # Small shapes consistent with the module's forward: x is (batch, input_size)
    batch, input_size, hidden_size, output_size = 8, 16, 32, 8

    key = jax.random.PRNGKey(0)
    kx, kp = jax.random.split(key)
    x = jax.random.normal(kx, (batch, input_size), dtype=jnp.float32)
    w1, b1, w2, b2 = init_params(kp, input_size, hidden_size, output_size)

    out = mlp_forward(x, w1, b1, w2, b2)
    out = jax.block_until_ready(out)

    # Pure-JAX f32 reference (same eval-mode semantics). Kernel uses bf16
    # matmul inputs with f32 accumulation, so tolerances are bf16-level.
    ref = jnp.maximum(x @ w1 + b1[None, :], 0.0) @ w2 + b2[None, :]
    assert out.shape == (batch, output_size)
    assert jnp.allclose(out, ref, atol=2e-2, rtol=2e-2), (
        f"max abs err {jnp.max(jnp.abs(out - ref))}")

    print("KERNEL_OK")
</pallas_src>

<mosaic_0001>
module attributes {stable_mosaic.version = 11 : i64} {
  func.func @mlp_kernel(%arg0: i32, %arg1: memref<8x128xbf16, #tpu.memory_space<vmem>>, %arg2: memref<128x128xbf16, #tpu.memory_space<vmem>>, %arg3: memref<1x128xf32, #tpu.memory_space<vmem>>, %arg4: memref<128x128xbf16, #tpu.memory_space<vmem>>, %arg5: memref<1x128xf32, #tpu.memory_space<vmem>>, %arg6: memref<8x128xf32, #tpu.memory_space<vmem>>) attributes {dimension_semantics = [#tpu.dimension_semantics<parallel>], iteration_bounds = array<i64: 1>, scalar_prefetch = 0 : i64, scratch_operands = 0 : i64, tpu.core_type = #tpu.core_type<tc>, window_params = [{transform_indices = @transform_0, window_bounds = array<i64: 8, 128>}, {pipeline_mode = #tpu.pipeline_mode<synchronous>, transform_indices = @transform_1, window_bounds = array<i64: 128, 128>}, {pipeline_mode = #tpu.pipeline_mode<synchronous>, transform_indices = @transform_2, window_bounds = array<i64: 1, 128>}, {pipeline_mode = #tpu.pipeline_mode<synchronous>, transform_indices = @transform_3, window_bounds = array<i64: 128, 128>}, {pipeline_mode = #tpu.pipeline_mode<synchronous>, transform_indices = @transform_4, window_bounds = array<i64: 1, 128>}, {transform_indices = @transform_5, window_bounds = array<i64: 8, 128>}]} {
    %c0 = arith.constant 0 : index
    %c0_0 = arith.constant 0 : index
    %0 = vector.load %arg1[%c0, %c0_0] : memref<8x128xbf16, #tpu.memory_space<vmem>>, vector<8x128xbf16>
    %c0_1 = arith.constant 0 : index
    %c0_2 = arith.constant 0 : index
    %1 = vector.load %arg2[%c0_1, %c0_2] : memref<128x128xbf16, #tpu.memory_space<vmem>>, vector<128x128xbf16>
    %cst = arith.constant dense<0.000000e+00> : vector<8x128xf32>
    %2 = tpu.matmul %0, %1, %cst {dimension_numbers = #tpu.dot_dimension_numbers<[1], [0], [0], [1], [0, 0, 1, 1], [], []>} : vector<8x128xbf16>, vector<128x128xbf16>, vector<8x128xf32> -> vector<8x128xf32>
    %c0_3 = arith.constant 0 : index
    %c0_4 = arith.constant 0 : index
    %3 = vector.load %arg3[%c0_3, %c0_4] : memref<1x128xf32, #tpu.memory_space<vmem>>, vector<1x128xf32>
    %4 = vector.broadcast %3 : vector<1x128xf32> to vector<8x128xf32>
    %5 = arith.addf %2, %4 : vector<8x128xf32>
    %cst_5 = arith.constant 0.000000e+00 : f32
    %6 = vector.broadcast %cst_5 : f32 to vector<8x128xf32>
    %7 = arith.maximumf %5, %6 : vector<8x128xf32>
    %8 = arith.truncf %7 : vector<8x128xf32> to vector<8x128xbf16>
    %c0_6 = arith.constant 0 : index
    %c0_7 = arith.constant 0 : index
    %9 = vector.load %arg4[%c0_6, %c0_7] : memref<128x128xbf16, #tpu.memory_space<vmem>>, vector<128x128xbf16>
    %cst_8 = arith.constant dense<0.000000e+00> : vector<8x128xf32>
    %10 = tpu.matmul %8, %9, %cst_8 {dimension_numbers = #tpu.dot_dimension_numbers<[1], [0], [0], [1], [0, 0, 1, 1], [], []>} : vector<8x128xbf16>, vector<128x128xbf16>, vector<8x128xf32> -> vector<8x128xf32>
    %c0_9 = arith.constant 0 : index
    %c0_10 = arith.constant 0 : index
    %11 = vector.load %arg5[%c0_9, %c0_10] : memref<1x128xf32, #tpu.memory_space<vmem>>, vector<1x128xf32>
    %12 = vector.broadcast %11 : vector<1x128xf32> to vector<8x128xf32>
    %13 = arith.addf %10, %12 : vector<8x128xf32>
    %c0_11 = arith.constant 0 : index
    %c0_12 = arith.constant 0 : index
    %14 = vector.load %arg6[%c0_11, %c0_12] : memref<8x128xf32, #tpu.memory_space<vmem>>, vector<8x128xf32>
    tpu.vector_store %arg6[%c0_11, %c0_12], %13 {strides = array<i32>} : memref<8x128xf32, #tpu.memory_space<vmem>>, vector<8x128xf32>,
    return
  }
  func.func @transform_0(%arg0: i32) -> (i32, i32) {
    %c0_i32 = arith.constant 0 : i32
    %c0_i32_0 = arith.constant 0 : i32
    return %arg0, %c0_i32 : i32, i32
  }
  func.func @transform_1(%arg0: i32) -> (i32, i32) {
    %c0_i32 = arith.constant 0 : i32
    %c0_i32_0 = arith.constant 0 : i32
    %c0_i32_1 = arith.constant 0 : i32
    return %c0_i32, %c0_i32_0 : i32, i32
  }
  func.func @transform_2(%arg0: i32) -> (i32, i32) {
    %c0_i32 = arith.constant 0 : i32
    %c0_i32_0 = arith.constant 0 : i32
    %c0_i32_1 = arith.constant 0 : i32
    return %c0_i32, %c0_i32_0 : i32, i32
  }
  func.func @transform_3(%arg0: i32) -> (i32, i32) {
    %c0_i32 = arith.constant 0 : i32
    %c0_i32_0 = arith.constant 0 : i32
    %c0_i32_1 = arith.constant 0 : i32
    return %c0_i32, %c0_i32_0 : i32, i32
  }
  func.func @transform_4(%arg0: i32) -> (i32, i32) {
    %c0_i32 = arith.constant 0 : i32
    %c0_i32_0 = arith.constant 0 : i32
    %c0_i32_1 = arith.constant 0 : i32
    return %c0_i32, %c0_i32_0 : i32, i32
  }
  func.func @transform_5(%arg0: i32) -> (i32, i32) {
    %c0_i32 = arith.constant 0 : i32
    %c0_i32_0 = arith.constant 0 : i32
    return %arg0, %c0_i32 : i32, i32
  }
}

</mosaic_0001>

<bundles_post_ra>
// kernel: mlp_forward.1
= control target key start
LH: loop header
LB: loop body
LE: loop exit
PB: predicated region body
PF: predicated region fallthrough
CT: control target
= control target key end

     0   :  { %v381_v1 = vmov 0.0   ;;  %vm382_vm0 = vmmov 0   ;;  %s483_s0 = inlined_call_operand.vmem [shape: bf16[8,128], index: 0, kind: input, shape index: {}]   ;;  %s484_s1 = inlined_call_operand.vmem [shape: bf16[128,128], index: 1, kind: input, shape index: {}]   ;;  %s485_s2 = inlined_call_operand.vmem [shape: f32[1,128], index: 2, kind: input, shape index: {}]   ;;  %s486_s3 = inlined_call_operand.vmem [shape: bf16[128,128], index: 3, kind: input, shape index: {}]   ;;  %s487_s4 = inlined_call_operand.vmem [shape: f32[1,128], index: 4, kind: input, shape index: {}]   ;;  %s488_s5 = inlined_call_operand.hbm [shape: f32[8,128], index: 5, kind: output, shape index: {}]  }
   0x1   :  { %v341_v0 = vld [vmem:[%s484_s1] sm:$0xff]   ;;  %298 = vmatprep.subr.bf16.mxu0 %v381_v1  ;;  %318 = vmatprep.subr.bf16.mxu1 %v381_v1  ;;  %v342_v2 = vld [vmem:[%s484_s1 + $0x8] sm:$0xff]   ;;  %v343_v3 = vld [vmem:[%s484_s1 + $0x10] sm:$0xff]  }
   0x2   :  { %299 = vmatpush3.bf16.msra.mxu0 %v341_v0  ;;  %314 = vmatprep.mubr.msk.bf16.mxu0 %vm382_vm0, %v381_v1  ;;  %v349_v4 = vld [vmem:[%s486_s3] sm:$0xff]   ;;  %v344_v5 = vld [vmem:[%s484_s1 + $0x18] sm:$0xff]   ;;  %v350_v6 = vld [vmem:[%s486_s3 + $0x8] sm:$0xff]  }
   0x3   :  { %300 = vmatprep.subr.bf16.mxu0 %v381_v1  ;;  %334 = vmatprep.mubr.msk.bf16.mxu1 %vm382_vm0, %v381_v1  ;;  %v345_v7 = vld [vmem:[%s484_s1 + $0x20] sm:$0xff]   ;;  %v351_v8 = vld [vmem:[%s486_s3 + $0x10] sm:$0xff]  }
   0x4   :  { %319 = vmatpush3.bf16.msra.mxu1 %v349_v4 }
   0x5   :  { %320 = vmatprep.subr.bf16.mxu1 %v381_v1 }
   0x6   :  { %301 = vmatpush3.bf16.msra.mxu0 %v342_v2 }
   0x7   :  { %302 = vmatprep.subr.bf16.mxu0 %v381_v1 }
   0x8   :  { %321 = vmatpush3.bf16.msra.mxu1 %v350_v6 }
   0x9   :  { %322 = vmatprep.subr.bf16.mxu1 %v381_v1 }
   0xa   :  { %303 = vmatpush3.bf16.msra.mxu0 %v343_v3 }
   0xb   :  { %304 = vmatprep.subr.bf16.mxu0 %v381_v1 }
   0xe   :  { %305 = vmatpush3.bf16.msra.mxu0 %v344_v5 }
   0xf   :  { %306 = vmatprep.subr.bf16.mxu0 %v381_v1 }
  0x10   :  { %10 = vsyncpa [#allocation3], 0  ;;  %v346_v9 = vld [vmem:[%s484_s1 + $0x28] sm:$0xff]   ;;  %323 = vmatpush3.bf16.msra.mxu1 %v351_v8  ;;  %v352_v10 = vld [vmem:[%s486_s3 + $0x18] sm:$0xff]   ;;  %s383_s29 = smov [#allocation2]  }
  0x11   :  { %324 = vmatprep.subr.bf16.mxu1 %v381_v1  ;;  %v347_v11 = vld [vmem:[%s484_s1 + $0x30] sm:$0xff]   ;;  %v353_v12 = vld [vmem:[%s486_s3 + $0x20] sm:$0xff]   ;;  %v348_v13 = vld [vmem:[%s484_s1 + $0x38] sm:$0xff]   ;;  %s254_s30 = sshll.u32 %s383_s29, 4  ;;  %s255_s30 = int_to_ptr.vmem [resolvable:$true] %s254_s30 }
  0x12   :  { %307 = vmatpush3.bf16.msra.mxu0 %v345_v7  ;;  %v354_v14 = vld [vmem:[%s486_s3 + $0x28] sm:$0xff]   ;;  %v22_v15 = vld [vmem:[%s483_s0] sm:$0xf]  ;;  %v355_v16 = vld [vmem:[%s486_s3 + $0x30] sm:$0xff]   ;;  %p362_p1 = scmp.lt.s32.totalorder %s255_s30, %s255_s30 }
  0x13   :  { %308 = vmatprep.subr.bf16.mxu0 %v381_v1  ;;  %v356_v17 = vld [vmem:[%s486_s3 + $0x38] sm:$0xff]   ;;  %v262_v18 = vld [vmem:[%s485_s2] ss:$0 sm:$0xff]  ;;  %s357_s2 = scalar_lea.vmem %s255_s30, 128 }
  0x14   :  { %325 = vmatpush3.bf16.msra.mxu1 %v352_v10  ;;  %v271_v26 = vld [vmem:[%s487_s4] ss:$0 sm:$0xff]  ;;  %p358_p0 = scmp.ne.s32.totalorder %s255_s30, %s357_s2  ;;  %p363_p2 = scmp.lt.s32.totalorder %s357_s2, %s357_s2 }
  0x15   :  { %326 = vmatprep.subr.bf16.mxu1 %v381_v1 }
  0x16   :  { %309 = vmatpush3.bf16.msra.mxu0 %v346_v9  ;;  %p364_p3 = por %p363_p2, %p362_p1 }
  0x17   :  { %310 = vmatprep.subr.bf16.mxu0 %v381_v1 }
  0x18   :  { %327 = vmatpush3.bf16.msra.mxu1 %v353_v12  ;;  %p365_p4 = pnand %p364_p3, %p358_p0 }
  0x19   :  { %328 = vmatprep.subr.bf16.mxu1 %v381_v1 }
  0x1a   :  { %311 = vmatpush3.bf16.msra.mxu0 %v347_v11 }
  0x1b   :  { %312 = vmatprep.subr.bf16.mxu0 %v381_v1 }
  0x1c   :  { %329 = vmatpush3.bf16.msra.mxu1 %v354_v14 }
  0x1d   :  { %330 = vmatprep.subr.bf16.mxu1 %v381_v1 }
  0x1e   :  { %313 = vmatpush3.bf16.msra.mxu0 %v348_v13 }
  0x20   :  { %331 = vmatpush3.bf16.msra.mxu1 %v355_v16 }
  0x21   :  { %315 = vmatmul.mubr.bf16.vlgmr.msra.gmra.mrb[0].mxu0 %v22_v15  ;;  %332 = vmatprep.subr.bf16.mxu1 %v381_v1 }
  0x24   :  { %333 = vmatpush3.bf16.msra.mxu1 %v356_v17 }
  0xf4   :  { %v128_v19 = vpop.f32.mrb[0].mxu0 }
  0xf5   :  { %v129_v20 = vadd.f32 %v262_v18, %v128_v19  ;;  %v316_v21 = vpop.f32.mrb[1].mxu0 }
  0xf6   :  { %v131_v22 = vpop.f32.mrb[2].mxu0 }
  0xf7   :  { %v134_v23 = vmax.f32 %v129_v20, 0.0  ;;  %v317_v24 = vpop.f32.mrb[3].mxu0 }
  0xf9   :  { %v135_v25 = vpack.c.bf16 %v134_v23, %v134_v23 }
  0xfb   :  { %335 = vmatmul.mubr.bf16.vlgmr.msra.gmra.mrb[0].mxu1 %v135_v25 }
 0x1ce   :  { %v241_v27 = vpop.f32.mrb[0].mxu1 }
 0x1cf   :  { %v242_v28 = vadd.f32 %v271_v26, %v241_v27  ;;  %v336_v29 = vpop.f32.mrb[1].mxu1 }
 0x1d0   :  { %v244_v30 = vpop.f32.mrb[2].mxu1 }
 0x1d1   :  { %247 = vst [vmem:[#allocation2] sm:$0xff] %v242_v28  ;;  %v337_v31 = vpop.f32.mrb[3].mxu1 }
 0x1d2   :  { %368 = shalt.err (!%p365_p4)
}
 0x1d3   :  { %s369_s4 = scalar_lea.hbm %s488_s5, 128 }
 0x1d4   :  { %p370_p5 = scmp.ne.s32.totalorder %s488_s5, %s369_s4  ;;  %p373_p6 = scmp.lt.u32.totalorder %s369_s4, %s488_s5 }
 0x1d6   :  { %p375_p7 = pnand %p373_p6, %p370_p5 }
 0x1d8   :  { %378 = shalt.err (!%p375_p7)
}
 0x1d9   :  { %257 = dma.vmem_to_hbm [thread:$0]  %s255_s30, 128, %s488_s5, [#allocation3]  }
 0x1da   :  { %379 = dma.done.wait [#allocation3], 128  }
 0x1db   :  { %380 = vsyncadd [#allocation3], 4294967168 }
 0x1dc   :  { %261 = vsyncpa [#allocation3], 1 }

</bundles_post_ra>
